<compile_context>
chip_gen: v5e
topology: v5e:2x2
jax: 0.10.0
libtpu: 0.0.40
codegen_flags: <defaults>
</compile_context>

<pallas_src>
import jax
import jax.numpy as jnp
import numpy as np
from jax.experimental import pallas as pl
from jax.experimental.pallas import tpu as pltpu


# ---------------------------------------------------------------------------
# Pallas kernel (fused MLP over one batch tile)
# ---------------------------------------------------------------------------
def _build_mlp_kernel(num_layers, activation_type):
    def act(h):
        if activation_type == 'tanh':
            return jnp.tanh(h)
        elif activation_type == 'ReLU':          # module uses LeakyReLU here
            return jnp.where(h >= 0, h, 0.01 * h)
        elif activation_type == 'SiLU':
            return h * jax.nn.sigmoid(h)
        else:
            return h

    def kernel(x_ref, *refs):
        out_ref = refs[-1]
        h = x_ref[...]                           # (TB, D0) in vregs
        for li in range(num_layers):             # statically unrolled
            w = refs[2 * li][...]                # (Din, Dout)
            b = refs[2 * li + 1][...]            # (1, Dout)
            h = jnp.dot(h, w, preferred_element_type=jnp.float32) + b
            h = act(h)                           # activation after EVERY Linear
        out_ref[...] = h

    return kernel


# ---------------------------------------------------------------------------
# Parameter construction (PyTorch-like init) + eval-mode BN folding
# ---------------------------------------------------------------------------
_BN_EPS = 1e-5


def init_raw_params(key, layer_sizes):
    """Linear weights/biases (uniform +-1/sqrt(fan_in)) + non-trivial BN stats."""
    n = len(layer_sizes) - 1
    raw = []
    for i in range(n):
        din, dout = layer_sizes[i], layer_sizes[i + 1]
        key, kw, kb = jax.random.split(key, 3)
        bound = 1.0 / np.sqrt(din)
        W = jax.random.uniform(kw, (dout, din), jnp.float32, -bound, bound)
        b = jax.random.uniform(kb, (dout,), jnp.float32, -bound, bound)
        bn = None
        if i != 0 and i < n - 1:                 # BatchNorm1d on middle layers
            key, k1, k2, k3, k4 = jax.random.split(key, 5)
            gamma = 1.0 + 0.1 * jax.random.normal(k1, (dout,), jnp.float32)
            beta = 0.1 * jax.random.normal(k2, (dout,), jnp.float32)
            r_mean = 0.1 * jax.random.normal(k3, (dout,), jnp.float32)
            r_var = 1.0 + 0.5 * jax.random.uniform(k4, (dout,), jnp.float32)
            bn = (gamma, beta, r_mean, r_var)
        raw.append({"W": W, "b": b, "bn": bn})
    return raw


def fold_params(raw):
    """Fold eval-mode BatchNorm into the preceding Linear (exact), transpose W."""
    layers = []
    for lp in raw:
        W, b, bn = lp["W"], lp["b"], lp["bn"]
        if bn is not None:
            gamma, beta, mean, var = bn
            scale = gamma / jnp.sqrt(var + _BN_EPS)
            W = W * scale[:, None]
            b = b * scale + (beta - mean * scale)
        layers.append({"w_t": jnp.asarray(W.T),          # (Din, Dout)
                       "b": b.reshape(1, -1)})           # (1, Dout)
    return {"layers": layers}


# ---------------------------------------------------------------------------
# Wrapper
# ---------------------------------------------------------------------------
def flexible_net_forward(params, x, activation_type='tanh', block_b=8):
    """Mirrors FlexibleNeuralNet.forward (inference): returns (B, 2, 120)."""
    B, D0 = x.shape
    layers = params["layers"]
    d_out = layers[-1]["w_t"].shape[1]
    assert d_out == 240, "final layer must have 240 features for view(B, 2, 120)"

    # Pad batch to a sublane-aligned tile so the grid blocks are (8k, lanes).
    b_pad = ((B + block_b - 1) // block_b) * block_b
    x_p = x.astype(jnp.float32)
    if b_pad != B:
        x_p = jnp.pad(x_p, ((0, b_pad - B), (0, 0)))

    grid = (b_pad // block_b,)
    in_specs = [pl.BlockSpec((block_b, D0), lambda i: (i, 0))]
    args = [x_p]
    for lp in layers:
        w_t, b = lp["w_t"], lp["b"]
        # Constant block index -> weights stay VMEM-resident across grid steps.
        in_specs.append(pl.BlockSpec(w_t.shape, lambda i: (0, 0)))
        in_specs.append(pl.BlockSpec(b.shape, lambda i: (0, 0)))
        args += [w_t, b]

    out = pl.pallas_call(
        _build_mlp_kernel(len(layers), activation_type),
        out_shape=jax.ShapeDtypeStruct((b_pad, d_out), jnp.float32),
        grid=grid,
        in_specs=in_specs,
        out_specs=pl.BlockSpec((block_b, d_out), lambda i: (i, 0)),
        compiler_params=pltpu.CompilerParams(
            dimension_semantics=("parallel",)),
    )(*args)

    out = out[:B]
    return out.reshape(B, 2, d_out // 2)


# ---------------------------------------------------------------------------
# Pure-JAX reference (explicit Linear -> BN(eval) -> activation -> Dropout=id)
# ---------------------------------------------------------------------------
def _ref_forward(raw, x, activation_type='tanh'):
    h = x.astype(jnp.float32)
    for lp in raw:
        h = h @ lp["W"].T + lp["b"]
        if lp["bn"] is not None:
            gamma, beta, mean, var = lp["bn"]
            h = (h - mean) / jnp.sqrt(var + _BN_EPS) * gamma + beta
        if activation_type == 'tanh':
            h = jnp.tanh(h)
        elif activation_type == 'ReLU':
            h = jnp.where(h >= 0, h, 0.01 * h)
        elif activation_type == 'SiLU':
            h = h * jax.nn.sigmoid(h)
        # Dropout is identity in inference mode.
    B = x.shape[0]
    return h.reshape(B, 2, h.shape[-1] // 2)


# ---------------------------------------------------------------------------
if __name__ == "__main__":
    # Small shapes consistent with the module: final width must be 240.
    layer_sizes = [64, 128, 128, 240]
    batch = 4
    activation_type = 'tanh'

    key = jax.random.PRNGKey(0)
    kx, kp = jax.random.split(key)
    x = jax.random.normal(kx, (batch, layer_sizes[0]), jnp.float32)

    raw = init_raw_params(kp, layer_sizes)
    params = fold_params(raw)

    out = flexible_net_forward(params, x, activation_type)
    jax.block_until_ready(out)

    ref = _ref_forward(raw, x, activation_type)
    np.testing.assert_allclose(np.asarray(out), np.asarray(ref),
                               rtol=1e-4, atol=1e-5)
    assert out.shape == (batch, 2, 120)

    print("KERNEL_OK")
</pallas_src>

<mosaic_0001>
module attributes {stable_mosaic.version = 11 : i64} {
  func.func @kernel(%arg0: i32, %arg1: memref<8x64xf32, #tpu.memory_space<vmem>>, %arg2: memref<64x128xf32, #tpu.memory_space<vmem>>, %arg3: memref<1x128xf32, #tpu.memory_space<vmem>>, %arg4: memref<128x128xf32, #tpu.memory_space<vmem>>, %arg5: memref<1x128xf32, #tpu.memory_space<vmem>>, %arg6: memref<128x240xf32, #tpu.memory_space<vmem>>, %arg7: memref<1x240xf32, #tpu.memory_space<vmem>>, %arg8: memref<8x240xf32, #tpu.memory_space<vmem>>) attributes {dimension_semantics = [#tpu.dimension_semantics<parallel>], iteration_bounds = array<i64: 1>, scalar_prefetch = 0 : i64, scratch_operands = 0 : i64, tpu.core_type = #tpu.core_type<tc>, window_params = [{transform_indices = @transform_0, window_bounds = array<i64: 8, 64>}, {pipeline_mode = #tpu.pipeline_mode<synchronous>, transform_indices = @transform_1, window_bounds = array<i64: 64, 128>}, {pipeline_mode = #tpu.pipeline_mode<synchronous>, transform_indices = @transform_2, window_bounds = array<i64: 1, 128>}, {pipeline_mode = #tpu.pipeline_mode<synchronous>, transform_indices = @transform_3, window_bounds = array<i64: 128, 128>}, {pipeline_mode = #tpu.pipeline_mode<synchronous>, transform_indices = @transform_4, window_bounds = array<i64: 1, 128>}, {pipeline_mode = #tpu.pipeline_mode<synchronous>, transform_indices = @transform_5, window_bounds = array<i64: 128, 240>}, {pipeline_mode = #tpu.pipeline_mode<synchronous>, transform_indices = @transform_6, window_bounds = array<i64: 1, 240>}, {transform_indices = @transform_7, window_bounds = array<i64: 8, 240>}]} {
    %c0 = arith.constant 0 : index
    %c0_0 = arith.constant 0 : index
    %0 = vector.load %arg1[%c0, %c0_0] : memref<8x64xf32, #tpu.memory_space<vmem>>, vector<8x64xf32>
    %c0_1 = arith.constant 0 : index
    %c0_2 = arith.constant 0 : index
    %1 = vector.load %arg2[%c0_1, %c0_2] : memref<64x128xf32, #tpu.memory_space<vmem>>, vector<64x128xf32>
    %c0_3 = arith.constant 0 : index
    %c0_4 = arith.constant 0 : index
    %2 = vector.load %arg3[%c0_3, %c0_4] : memref<1x128xf32, #tpu.memory_space<vmem>>, vector<1x128xf32>
    %cst = arith.constant dense<0.000000e+00> : vector<8x128xf32>
    %3 = tpu.matmul %0, %1, %cst {dimension_numbers = #tpu.dot_dimension_numbers<[1], [0], [0], [1], [0, 0, 1, 1], [], []>} : vector<8x64xf32>, vector<64x128xf32>, vector<8x128xf32> -> vector<8x128xf32>
    %4 = vector.broadcast %2 : vector<1x128xf32> to vector<8x128xf32>
    %5 = arith.addf %3, %4 : vector<8x128xf32>
    %6 = math.tanh %5 : vector<8x128xf32>
    %c0_5 = arith.constant 0 : index
    %c0_6 = arith.constant 0 : index
    %7 = vector.load %arg4[%c0_5, %c0_6] : memref<128x128xf32, #tpu.memory_space<vmem>>, vector<128x128xf32>
    %c0_7 = arith.constant 0 : index
    %c0_8 = arith.constant 0 : index
    %8 = vector.load %arg5[%c0_7, %c0_8] : memref<1x128xf32, #tpu.memory_space<vmem>>, vector<1x128xf32>
    %cst_9 = arith.constant dense<0.000000e+00> : vector<8x128xf32>
    %9 = tpu.matmul %6, %7, %cst_9 {dimension_numbers = #tpu.dot_dimension_numbers<[1], [0], [0], [1], [0, 0, 1, 1], [], []>} : vector<8x128xf32>, vector<128x128xf32>, vector<8x128xf32> -> vector<8x128xf32>
    %10 = vector.broadcast %8 : vector<1x128xf32> to vector<8x128xf32>
    %11 = arith.addf %9, %10 : vector<8x128xf32>
    %12 = math.tanh %11 : vector<8x128xf32>
    %c0_10 = arith.constant 0 : index
    %c0_11 = arith.constant 0 : index
    %13 = vector.load %arg6[%c0_10, %c0_11] : memref<128x240xf32, #tpu.memory_space<vmem>>, vector<128x240xf32>
    %c0_12 = arith.constant 0 : index
    %c0_13 = arith.constant 0 : index
    %14 = vector.load %arg7[%c0_12, %c0_13] : memref<1x240xf32, #tpu.memory_space<vmem>>, vector<1x240xf32>
    %cst_14 = arith.constant dense<0.000000e+00> : vector<8x240xf32>
    %15 = tpu.matmul %12, %13, %cst_14 {dimension_numbers = #tpu.dot_dimension_numbers<[1], [0], [0], [1], [0, 0, 1, 1], [], []>} : vector<8x128xf32>, vector<128x240xf32>, vector<8x240xf32> -> vector<8x240xf32>
    %16 = vector.broadcast %14 : vector<1x240xf32> to vector<8x240xf32>
    %17 = arith.addf %15, %16 : vector<8x240xf32>
    %18 = math.tanh %17 : vector<8x240xf32>
    %c0_15 = arith.constant 0 : index
    %c0_16 = arith.constant 0 : index
    %19 = vector.load %arg8[%c0_15, %c0_16] : memref<8x240xf32, #tpu.memory_space<vmem>>, vector<8x240xf32>
    tpu.vector_store %arg8[%c0_15, %c0_16], %18 {strides = array<i32>} : memref<8x240xf32, #tpu.memory_space<vmem>>, vector<8x240xf32>,
    return
  }
  func.func @transform_0(%arg0: i32) -> (i32, i32) {
    %c0_i32 = arith.constant 0 : i32
    %c0_i32_0 = arith.constant 0 : i32
    return %arg0, %c0_i32 : i32, i32
  }
  func.func @transform_1(%arg0: i32) -> (i32, i32) {
    %c0_i32 = arith.constant 0 : i32
    %c0_i32_0 = arith.constant 0 : i32
    %c0_i32_1 = arith.constant 0 : i32
    return %c0_i32, %c0_i32_0 : i32, i32
  }
  func.func @transform_2(%arg0: i32) -> (i32, i32) {
    %c0_i32 = arith.constant 0 : i32
    %c0_i32_0 = arith.constant 0 : i32
    %c0_i32_1 = arith.constant 0 : i32
    return %c0_i32, %c0_i32_0 : i32, i32
  }
  func.func @transform_3(%arg0: i32) -> (i32, i32) {
    %c0_i32 = arith.constant 0 : i32
    %c0_i32_0 = arith.constant 0 : i32
    %c0_i32_1 = arith.constant 0 : i32
    return %c0_i32, %c0_i32_0 : i32, i32
  }
  func.func @transform_4(%arg0: i32) -> (i32, i32) {
    %c0_i32 = arith.constant 0 : i32
    %c0_i32_0 = arith.constant 0 : i32
    %c0_i32_1 = arith.constant 0 : i32
    return %c0_i32, %c0_i32_0 : i32, i32
  }
  func.func @transform_5(%arg0: i32) -> (i32, i32) {
    %c0_i32 = arith.constant 0 : i32
    %c0_i32_0 = arith.constant 0 : i32
    %c0_i32_1 = arith.constant 0 : i32
    return %c0_i32, %c0_i32_0 : i32, i32
  }
  func.func @transform_6(%arg0: i32) -> (i32, i32) {
    %c0_i32 = arith.constant 0 : i32
    %c0_i32_0 = arith.constant 0 : i32
    %c0_i32_1 = arith.constant 0 : i32
    return %c0_i32, %c0_i32_0 : i32, i32
  }
  func.func @transform_7(%arg0: i32) -> (i32, i32) {
    %c0_i32 = arith.constant 0 : i32
    %c0_i32_0 = arith.constant 0 : i32
    return %arg0, %c0_i32 : i32, i32
  }
}

</mosaic_0001>

<bundles_post_ra>
// kernel: tpu_custom_call.1
= control target key start
LH: loop header
LB: loop body
LE: loop exit
PB: predicated region body
PF: predicated region fallthrough
CT: control target
= control target key end

     0   :  { %s467_s0 = inlined_call_operand.vmem [shape: f32[8,64], index: 0, kind: input, shape index: {}]   ;;  %s468_s1 = inlined_call_operand.vmem [shape: f32[64,128], index: 1, kind: input, shape index: {}]   ;;  %s469_s2 = inlined_call_operand.vmem [shape: f32[1,128], index: 2, kind: input, shape index: {}]   ;;  %s470_s3 = inlined_call_operand.vmem [shape: f32[128,128], index: 3, kind: input, shape index: {}]   ;;  %s471_s4 = inlined_call_operand.vmem [shape: f32[1,128], index: 4, kind: input, shape index: {}]   ;;  %s472_s5 = inlined_call_operand.vmem [shape: f32[128,240], index: 5, kind: input, shape index: {}]   ;;  %s473_s6 = inlined_call_operand.vmem [shape: f32[1,240], index: 6, kind: input, shape index: {}]   ;;  %s474_s7 = inlined_call_operand.hbm [shape: f32[8,240], index: 7, kind: output, shape index: {}]  }
   0x1   :  { %v35_v0 = vld [vmem:[%s468_s1 + $0x38] sm:$0xff]  ;;  %v34_v1 = vld [vmem:[%s468_s1 + $0x30] sm:$0xff]  ;;  %v33_v2 = vld [vmem:[%s468_s1 + $0x28] sm:$0xff] }
   0x2   :  { %52 = vmatpush.msra.mxu0 %v35_v0  ;;  %v80_v3 = vld [vmem:[%s470_s3 + $0x78] sm:$0xff]  ;;  %v79_v4 = vld [vmem:[%s470_s3 + $0x70] sm:$0xff]  ;;  %v32_v5 = vld [vmem:[%s468_s1 + $0x20] sm:$0xff] }
   0x3   :  { %85 = vmatpush.msra.mxu1 %v80_v3  ;;  %v78_v6 = vld [vmem:[%s470_s3 + $0x68] sm:$0xff]  ;;  %v31_v7 = vld [vmem:[%s468_s1 + $0x18] sm:$0xff]  ;;  %v77_v8 = vld [vmem:[%s470_s3 + $0x60] sm:$0xff] }
   0x4   :  { %53 = vmatpush.msra.mxu0 %v34_v1 }
   0x5   :  { %86 = vmatpush.msra.mxu1 %v79_v4 }
   0x6   :  { %54 = vmatpush.msra.mxu0 %v33_v2 }
   0x8   :  { %55 = vmatpush.msra.mxu0 %v32_v5 }
   0x9   :  { %12 = vsyncpa [#allocation3], 0  ;;  %v30_v9 = vld [vmem:[%s468_s1 + $0x10] sm:$0xff]  ;;  %87 = vmatpush.msra.mxu1 %v78_v6  ;;  %v76_v10 = vld [vmem:[%s470_s3 + $0x58] sm:$0xff]  ;;  %vm40_vm0 = vcmask 523264   ;;  %s196_s19 = sshll.u32 %s474_s7, 4  ;;  %s197_s19 = int_to_ptr.hbm [resolvable:$true] %s196_s19 }
   0xa   :  { %56 = vmatpush.msra.mxu0 %v31_v7  ;;  %v29_v11 = vld [vmem:[%s468_s1 + $0x8] sm:$0xff]  ;;  %v75_v12 = vld [vmem:[%s470_s3 + $0x50] sm:$0xff]  ;;  %v28_v13 = vld [vmem:[%s468_s1] sm:$0xff]  ;;  %vm187_vm1 = vcmask 916480  }
   0xb   :  { %88 = vmatpush.msra.mxu1 %v77_v8  ;;  %v27_v14 = vld [vmem:[%s467_s0] sm:$0xff]  ;;  %v74_v15 = vld [vmem:[%s470_s3 + $0x48] sm:$0xff]  ;;  %v72_v17 = vld [vmem:[%s470_s3 + $0x38] sm:$0xff] }
   0xc   :  { %57 = vmatpush.msra.mxu0 %v30_v9  ;;  %v73_v16 = vld [vmem:[%s470_s3 + $0x40] sm:$0xff]  ;;  %v71_v18 = vld [vmem:[%s470_s3 + $0x30] sm:$0xff]  ;;  %v70_v19 = vld [vmem:[%s470_s3 + $0x28] sm:$0xff] }
   0xd   :  { %89 = vmatpush.msra.mxu1 %v76_v10  ;;  %v69_v20 = vld [vmem:[%s470_s3 + $0x20] sm:$0xff]  ;;  %v68_v21 = vld [vmem:[%s470_s3 + $0x18] sm:$0xff]  ;;  %v67_v22 = vld [vmem:[%s470_s3 + $0x10] sm:$0xff] }
   0xe   :  { %58 = vmatpush.msra.mxu0 %v29_v11  ;;  %v66_v23 = vld [vmem:[%s470_s3 + $0x8] sm:$0xff]  ;;  %v65_v24 = vld [vmem:[%s470_s3] sm:$0xff]  ;;  %v136_v25 = vld [vmem:[%s472_s5 + $0xf0] sm:$0xff] }
   0xf   :  { %90 = vmatpush.msra.mxu1 %v75_v12  ;;  %v137_v26 = vld [vmem:[%s472_s5 + $0xf8] sm:$0xff]  ;;  %v134_v27 = vld [vmem:[%s472_s5 + $0xe0] sm:$0xff]  ;;  %144 = vmatpush.msra.mxu2 %v136_v25  ;;  %v135_v28 = vld [vmem:[%s472_s5 + $0xe8] sm:$0xff] }
  0x10   :  { %59 = vmatpush.msra.mxu0 %v28_v13  ;;  %164 = vmatpush.msra.mxu3 %v137_v26  ;;  %v132_v29 = vld [vmem:[%s472_s5 + $0xd0] sm:$0xff]  ;;  %v133_v30 = vld [vmem:[%s472_s5 + $0xd8] sm:$0xff]  ;;  %v130_v31 = vld [vmem:[%s472_s5 + $0xc0] sm:$0xff] }
  0x11   :  { %205 = vmatmul.msk.f32.vlgmr.msra.gmra.mxu0 %vm40_vm0, %v27_v14  ;;  %91 = vmatpush.msra.mxu1 %v74_v15  ;;  %v131_v32 = vld [vmem:[%s472_s5 + $0xc8] sm:$0xff]  ;;  %v128_v33 = vld [vmem:[%s472_s5 + $0xb0] sm:$0xff]  ;;  %v129_v34 = vld [vmem:[%s472_s5 + $0xb8] sm:$0xff] }
  0x12   :  { %145 = vmatpush.msra.mxu2 %v134_v27  ;;  %165 = vmatpush.msra.mxu3 %v135_v28  ;;  %v126_v35 = vld [vmem:[%s472_s5 + $0xa0] sm:$0xff]  ;;  %v127_v36 = vld [vmem:[%s472_s5 + $0xa8] sm:$0xff]  ;;  %v124_v37 = vld [vmem:[%s472_s5 + $0x90] sm:$0xff] }
  0x13   :  { %92 = vmatpush.msra.mxu1 %v73_v16  ;;  %v125_v38 = vld [vmem:[%s472_s5 + $0x98] sm:$0xff]  ;;  %v122_v39 = vld [vmem:[%s472_s5 + $0x80] sm:$0xff]  ;;  %v123_v40 = vld [vmem:[%s472_s5 + $0x88] sm:$0xff] }
  0x14   :  { %146 = vmatpush.msra.mxu2 %v132_v29  ;;  %166 = vmatpush.msra.mxu3 %v133_v30  ;;  %v120_v41 = vld [vmem:[%s472_s5 + $0x70] sm:$0xff]  ;;  %v121_v42 = vld [vmem:[%s472_s5 + $0x78] sm:$0xff]  ;;  %v118_v43 = vld [vmem:[%s472_s5 + $0x60] sm:$0xff] }
  0x15   :  { %93 = vmatpush.msra.mxu1 %v72_v17  ;;  %v119_v44 = vld [vmem:[%s472_s5 + $0x68] sm:$0xff]  ;;  %v116_v45 = vld [vmem:[%s472_s5 + $0x50] sm:$0xff]  ;;  %v117_v46 = vld [vmem:[%s472_s5 + $0x58] sm:$0xff] }
  0x16   :  { %147 = vmatpush.msra.mxu2 %v130_v31  ;;  %167 = vmatpush.msra.mxu3 %v131_v32  ;;  %v207_v47 = vld [vmem:[%s469_s2] ss:$0 sm:$0xff]  ;;  %v115_v52 = vld [vmem:[%s472_s5 + $0x48] sm:$0xff]  ;;  %v112_v53 = vld [vmem:[%s472_s5 + $0x30] sm:$0xff] }
  0x17   :  { %94 = vmatpush.msra.mxu1 %v71_v18  ;;  %v114_v51 = vld [vmem:[%s472_s5 + $0x40] sm:$0xff]  ;;  %v113_v54 = vld [vmem:[%s472_s5 + $0x38] sm:$0xff]  ;;  %v111_v56 = vld [vmem:[%s472_s5 + $0x28] sm:$0xff] }
  0x18   :  { %148 = vmatpush.msra.mxu2 %v128_v33  ;;  %168 = vmatpush.msra.mxu3 %v129_v34  ;;  %v110_v55 = vld [vmem:[%s472_s5 + $0x20] sm:$0xff]  ;;  %v108_v57 = vld [vmem:[%s472_s5 + $0x10] sm:$0xff]  ;;  %v109_v58 = vld [vmem:[%s472_s5 + $0x18] sm:$0xff] }
  0x19   :  { %95 = vmatpush.msra.mxu1 %v70_v19  ;;  %v106_v59 = vld [vmem:[%s472_s5] sm:$0xff]  ;;  %v107_v60 = vld [vmem:[%s472_s5 + $0x8] sm:$0xff]  ;;  %s243_s5 = smov [#allocation2]  }
  0x1a   :  { %149 = vmatpush.msra.mxu2 %v126_v35  ;;  %169 = vmatpush.msra.mxu3 %v127_v36  ;;  %v208_v61 = vld [vmem:[%s471_s4] ss:$0 sm:$0xff]  ;;  %s194_s4 = sshll.u32 %s243_s5, 4  ;;  %s195_s4 = int_to_ptr.vmem [resolvable:$true] %s194_s4 }
  0x1b   :  { %96 = vmatpush.msra.mxu1 %v69_v20  ;;  %v138_v1 = vld [vmem:[%s473_s6] sm:$0x3] }
  0x1c   :  { %150 = vmatpush.msra.mxu2 %v124_v37  ;;  %170 = vmatpush.msra.mxu3 %v125_v38  ;;  %v140_v2 = vperm.slane %v138_v1, 0  ;;  %v141_v3 = vperm.slane %v138_v1, 1 }
  0x1d   :  { %97 = vmatpush.msra.mxu1 %v68_v21 }
  0x1e   :  { %151 = vmatpush.msra.mxu2 %v122_v39  ;;  %171 = vmatpush.msra.mxu3 %v123_v40 }
  0x1f   :  { %98 = vmatpush.msra.mxu1 %v67_v22 }
  0x20   :  { %152 = vmatpush.msra.mxu2 %v120_v41  ;;  %172 = vmatpush.msra.mxu3 %v121_v42 }
  0x21   :  { %99 = vmatpush.msra.mxu1 %v66_v23 }
  0x22   :  { %153 = vmatpush.msra.mxu2 %v118_v43  ;;  %173 = vmatpush.msra.mxu3 %v119_v44 }
  0x23   :  { %100 = vmatpush.msra.mxu1 %v65_v24 }
  0x24   :  { %154 = vmatpush.msra.mxu2 %v116_v45  ;;  %174 = vmatpush.msra.mxu3 %v117_v46 }
  0x26   :  { %155 = vmatpush.msra.mxu2 %v114_v51  ;;  %175 = vmatpush.msra.mxu3 %v115_v52 }
  0x28   :  { %156 = vmatpush.msra.mxu2 %v112_v53  ;;  %176 = vmatpush.msra.mxu3 %v113_v54 }
  0x2a   :  { %157 = vmatpush.msra.mxu2 %v110_v55  ;;  %177 = vmatpush.msra.mxu3 %v111_v56 }
  0x2c   :  { %158 = vmatpush.msra.mxu2 %v108_v57  ;;  %178 = vmatpush.msra.mxu3 %v109_v58 }
  0x2e   :  { %159 = vmatpush.msra.mxu2 %v106_v59  ;;  %179 = vmatpush.msra.mxu3 %v107_v60 }
  0x8e   :  { %v61_v48 = vpop.f32.mrf.mxu0 }
  0x8f   :  { %v62_v49 = vadd.f32 %v207_v47, %v61_v48 }
  0x91   :  { %209 = vtanh.f32 %v62_v49 }
  0x97   :  { %v210_v50 = vpop.eup %209 }
  0x98   :  { %101 = vmatmul.f32.vlgmr.msra.gmra.mxu1 %v210_v50 }
 0x115   :  { %v102_v62 = vpop.f32.mrf.mxu1 }
 0x116   :  { %v103_v63 = vadd.f32 %v208_v61, %v102_v62 }
 0x118   :  { %211 = vtanh.f32 %v103_v63 }
 0x11e   :  { %v212_v0 = vpop.eup %211 }
 0x11f   :  { %160 = vmatmul.f32.vlgmr.msra.gmra.mxu2 %v212_v0  ;;  %180 = vmatmul.f32.vlgmr.msra.gmra.mxu3 %v212_v0 }
 0x1a2   :  { %v161_v4 = vpop.f32.mrf.mxu2  ;;  %v181_v5 = vpop.f32.mrf.mxu3 }
 0x1a3   :  { %v162_v6 = vadd.f32 %v161_v4, %v140_v2  ;;  %v182_v7 = vadd.f32 %v181_v5, %v141_v3 }
 0x1a5   :  { %213 = vtanh.f32 %v162_v6 }
 0x1a6   :  { %215 = vtanh.f32 %v182_v7 }
 0x1ab   :  { %v214_v8 = vpop.eup %213 }
 0x1ac   :  { %v216_v9 = vpop.eup %215  ;;  %186 = vst [vmem:[#allocation2] sm:$0xff] %v214_v8 }
 0x1ad   :  { %188 = vst.msk [vmem:[#allocation2 + $0x8] sm:$0xff] %vm187_vm1, %v216_v9 }
 0x1ae   :  { %199 = dma.vmem_to_hbm [thread:$0]  %s195_s4, 256, %s197_s19, [#allocation3]  }
 0x1af   :  { %241 = dma.done.wait [#allocation3], 256  }
 0x1b0   :  { %242 = vsyncadd [#allocation3], 4294967040 }
 0x1b1   :  { %204 = vsyncpa [#allocation3], 1 }

</bundles_post_ra>
